<compile_context>
chip_gen: v6e
topology: v6e:2x2x1
jax: 0.10.0
libtpu: 0.0.40
codegen_flags: <defaults>
</compile_context>

<pallas_src>
import functools

import jax
import jax.numpy as jnp
from jax.experimental import pallas as pl
from jax.experimental.pallas import tpu as pltpu


def _rope_kernel(x_ref, cos_ref, sin_ref, o_ref, *, half, rotary_dim):
    # x_ref/o_ref: (tR, D) tiles of rows flattened over (batch, seq, head).
    # cos_ref/sin_ref: (tR, half) f32 per-row tables (already broadcast over heads).
    cos = cos_ref[...]
    sin = sin_ref[...]
    x1 = x_ref[:, :half].astype(jnp.float32)
    x2 = x_ref[:, half:rotary_dim].astype(jnp.float32)
    # Sliced stores instead of a lane-axis concatenate (no full-width temp).
    o_ref[:, :half] = (x1 * cos - x2 * sin).astype(o_ref.dtype)
    o_ref[:, half:rotary_dim] = (x2 * cos + x1 * sin).astype(o_ref.dtype)
    if rotary_dim < o_ref.shape[-1]:
        # Pass-through tail (rotary_ndims < head_dim).
        o_ref[:, rotary_dim:] = x_ref[:, rotary_dim:]


def _pick_row_tile(num_rows, bytes_per_row, vmem_budget_bytes, max_rows=1024):
    """Largest multiple-of-8 row tile that fits the (double-buffered) budget."""
    t = vmem_budget_bytes // max(bytes_per_row, 1)
    t = min(t, max_rows, num_rows)
    t = max(8, (t // 8) * 8)
    if t >= num_rows:
        return num_rows                      # single block == full extent (legal)
    # Prefer a tile that evenly divides the row count (avoids a ragged block).
    cand = t
    for _ in range(64):
        if cand < 8:
            break
        if num_rows % cand == 0:
            return cand
        cand -= 8
    return t                                 # ragged last block handled by cdiv grid


def rotary_embedding_forward(x, position_ids, num_head, head_dim, offset,
                             rotary_ndims, base=10000.0,
                             vmem_budget_bytes=16 * 1024 * 1024):
    """Forward of ipex.llm.modules.RotaryEmbedding (Llama-style).

    x:            [batch, seq, num_head, head_dim]
    position_ids: [batch, seq] (int)
    returns:      [batch, seq, num_head, head_dim]
    """
    B, S, H, D = x.shape
    assert H == num_head and D == head_dim
    Dr = rotary_ndims
    assert Dr % 2 == 0 and Dr <= D
    assert offset == Dr // 2, "only rotary_half (Llama) style supported"
    half = Dr // 2

    # --- glue: per-token cos/sin from position_ids (plain JAX) ---
    inv_freq = 1.0 / (base ** (jnp.arange(0, Dr, 2, dtype=jnp.float32) / Dr))
    # positions cast to f32: exact for positions < 2**24.
    angles = position_ids.astype(jnp.float32)[..., None] * inv_freq   # [B,S,half]
    cos = jnp.cos(angles)
    sin = jnp.sin(angles)

    R = B * S * H
    # Broadcast across heads so kernel rows and cos/sin rows line up 1:1.
    cos_rows = jnp.broadcast_to(cos[:, :, None, :], (B, S, H, half)).reshape(R, half)
    sin_rows = jnp.broadcast_to(sin[:, :, None, :], (B, S, H, half)).reshape(R, half)

    # Flatten (batch, seq, head) into the sublane axis; head_dim on lanes.
    xf = x.reshape(R, D)

    x_bytes = x.dtype.itemsize
    # Double-buffered x-in + x-out blocks plus f32 cos/sin blocks, per row:
    bytes_per_row = 2 * (2 * D * x_bytes + 2 * half * 4)
    tR = _pick_row_tile(R, bytes_per_row, vmem_budget_bytes)
    grid = (pl.cdiv(R, tR),)

    out = pl.pallas_call(
        functools.partial(_rope_kernel, half=half, rotary_dim=Dr),
        out_shape=jax.ShapeDtypeStruct((R, D), x.dtype),
        grid=grid,
        in_specs=[
            pl.BlockSpec((tR, D), lambda i: (i, 0)),
            pl.BlockSpec((tR, half), lambda i: (i, 0)),
            pl.BlockSpec((tR, half), lambda i: (i, 0)),
        ],
        out_specs=pl.BlockSpec((tR, D), lambda i: (i, 0)),
        compiler_params=pltpu.CompilerParams(
            dimension_semantics=("parallel",),
            vmem_limit_bytes=32 * 1024 * 1024),
    )(xf, cos_rows, sin_rows)
    return out.reshape(B, S, H, D)


def _rope_reference(x, position_ids, rotary_ndims, base=10000.0):
    """Pure-JAX reference for correctness checking."""
    B, S, H, D = x.shape
    Dr = rotary_ndims
    half = Dr // 2
    inv_freq = 1.0 / (base ** (jnp.arange(0, Dr, 2, dtype=jnp.float32) / Dr))
    angles = position_ids.astype(jnp.float32)[..., None] * inv_freq   # [B,S,half]
    cos = jnp.cos(angles)[:, :, None, :]                              # [B,S,1,half]
    sin = jnp.sin(angles)[:, :, None, :]
    xf = x.astype(jnp.float32)
    x1 = xf[..., :half]
    x2 = xf[..., half:Dr]
    o1 = x1 * cos - x2 * sin
    o2 = x2 * cos + x1 * sin
    out = jnp.concatenate([o1, o2, xf[..., Dr:]], axis=-1)
    return out.astype(x.dtype)


if __name__ == "__main__":
    # Module "init": max_position_embeddings=2048, pos_embd_dim=32, base=10000,
    # backbone="LlamaForCausalLM" (no learned weights in this module).
    max_position_embeddings = 2048
    pos_embd_dim = 32
    base = 10000.0

    # Small forward shapes: [batch=2, seq=8, num_head=4, head_dim=32]
    B, S, H, D = 2, 8, 4, 32
    rotary_ndims = pos_embd_dim          # = head_dim for Llama
    offset = rotary_ndims // 2           # Llama-style half rotation

    key = jax.random.PRNGKey(0)
    x = jax.random.normal(key, (B, S, H, D), dtype=jnp.float32)
    position_ids = jnp.broadcast_to(jnp.arange(S, dtype=jnp.int32)[None, :], (B, S))

    out = rotary_embedding_forward(x, position_ids, H, D, offset,
                                   rotary_ndims, base=base)
    out = jax.block_until_ready(out)

    ref = _rope_reference(x, position_ids, rotary_ndims, base=base)
    assert out.shape == (B, S, H, D)
    assert jnp.allclose(out, ref, atol=1e-5, rtol=1e-5), "mismatch vs reference"

    print("KERNEL_OK")
</pallas_src>

<mosaic_0001>
module attributes {stable_mosaic.version = 11 : i64} {
  func.func @_rope_kernel(%arg0: i32, %arg1: memref<64x32xf32, #tpu.memory_space<vmem>>, %arg2: memref<64x16xf32, #tpu.memory_space<vmem>>, %arg3: memref<64x16xf32, #tpu.memory_space<vmem>>, %arg4: memref<64x32xf32, #tpu.memory_space<vmem>>) attributes {dimension_semantics = [#tpu.dimension_semantics<parallel>], iteration_bounds = array<i64: 1>, scalar_prefetch = 0 : i64, scratch_operands = 0 : i64, tpu.core_type = #tpu.core_type<tc>, window_params = [{transform_indices = @transform_0, window_bounds = array<i64: 64, 32>}, {transform_indices = @transform_1, window_bounds = array<i64: 64, 16>}, {transform_indices = @transform_2, window_bounds = array<i64: 64, 16>}, {transform_indices = @transform_3, window_bounds = array<i64: 64, 32>}]} {
    %c0 = arith.constant 0 : index
    %c0_0 = arith.constant 0 : index
    %0 = vector.load %arg2[%c0, %c0_0] : memref<64x16xf32, #tpu.memory_space<vmem>>, vector<64x16xf32>
    %c0_1 = arith.constant 0 : index
    %c0_2 = arith.constant 0 : index
    %1 = vector.load %arg3[%c0_1, %c0_2] : memref<64x16xf32, #tpu.memory_space<vmem>>, vector<64x16xf32>
    %c0_3 = arith.constant 0 : index
    %c0_4 = arith.constant 0 : index
    %2 = vector.load %arg1[%c0_3, %c0_4] : memref<64x32xf32, #tpu.memory_space<vmem>>, vector<64x16xf32>
    %c0_5 = arith.constant 0 : index
    %c16 = arith.constant 16 : index
    %3 = vector.load %arg1[%c0_5, %c16] : memref<64x32xf32, #tpu.memory_space<vmem>>, vector<64x16xf32>
    %4 = arith.mulf %2, %0 : vector<64x16xf32>
    %5 = arith.mulf %3, %1 : vector<64x16xf32>
    %6 = arith.subf %4, %5 : vector<64x16xf32>
    %c0_6 = arith.constant 0 : index
    %c0_7 = arith.constant 0 : index
    %7 = vector.load %arg4[%c0_6, %c0_7] : memref<64x32xf32, #tpu.memory_space<vmem>>, vector<64x16xf32>
    tpu.vector_store %arg4[%c0_6, %c0_7], %6 {strides = array<i32>} : memref<64x32xf32, #tpu.memory_space<vmem>>, vector<64x16xf32>,
    %8 = arith.mulf %3, %0 : vector<64x16xf32>
    %9 = arith.mulf %2, %1 : vector<64x16xf32>
    %10 = arith.addf %8, %9 : vector<64x16xf32>
    %c0_8 = arith.constant 0 : index
    %c16_9 = arith.constant 16 : index
    %11 = vector.load %arg4[%c0_8, %c16_9] : memref<64x32xf32, #tpu.memory_space<vmem>>, vector<64x16xf32>
    tpu.vector_store %arg4[%c0_8, %c16_9], %10 {strides = array<i32>} : memref<64x32xf32, #tpu.memory_space<vmem>>, vector<64x16xf32>,
    return
  }
  func.func @transform_0(%arg0: i32) -> (i32, i32) {
    %c0_i32 = arith.constant 0 : i32
    %c0_i32_0 = arith.constant 0 : i32
    return %arg0, %c0_i32 : i32, i32
  }
  func.func @transform_1(%arg0: i32) -> (i32, i32) {
    %c0_i32 = arith.constant 0 : i32
    %c0_i32_0 = arith.constant 0 : i32
    return %arg0, %c0_i32 : i32, i32
  }
  func.func @transform_2(%arg0: i32) -> (i32, i32) {
    %c0_i32 = arith.constant 0 : i32
    %c0_i32_0 = arith.constant 0 : i32
    return %arg0, %c0_i32 : i32, i32
  }
  func.func @transform_3(%arg0: i32) -> (i32, i32) {
    %c0_i32 = arith.constant 0 : i32
    %c0_i32_0 = arith.constant 0 : i32
    return %arg0, %c0_i32 : i32, i32
  }
}

</mosaic_0001>

<bundles_post_ra>
// kernel: tpu_custom_call.1
= control target key start
LH: loop header
LB: loop body
LE: loop exit
PB: predicated region body
PF: predicated region fallthrough
CT: control target
= control target key end

     0   :  { %s238_s16 = smov 16   ;;  %s239_s29 = smov 112   ;;  %vm126_vm0 = vcmask 130048   ;;  %vm223_vm1 = vcmask 261248   ;;  %s508_s2 = inlined_call_operand.vmem [shape: f32[64,16], index: 2, kind: input, shape index: {}]   ;;  %s509_s1 = inlined_call_operand.vmem [shape: f32[64,16], index: 1, kind: input, shape index: {}]   ;;  %s510_s0 = inlined_call_operand.vmem [shape: f32[64,32], index: 0, kind: input, shape index: {}]   ;;  %s511_s3 = inlined_call_operand.vmem [shape: f32[64,32], index: 3, kind: output, shape index: {}]  }
   0x1   :  { %v22_v0 = vld [vmem:[%s508_s2] sm:$0xff]  ;;  %v24_v1 = vld [vmem:[%s508_s2 + $0x10] sm:$0xff]  ;;  %v23_v2 = vld [vmem:[%s508_s2 + $0x8] sm:$0xff] }
   0x2   :  { %54 = vrot.lane.b32.xlu0 %v22_v0, %s238_s16  ;;  %58 = vrot.lane.b32.xlu1 %v24_v1, %s238_s16  ;;  %v25_v3 = vld [vmem:[%s508_s2 + $0x18] sm:$0xff]  ;;  %v26_v4 = vld [vmem:[%s508_s2 + $0x20] sm:$0xff] }
   0x3   :  { %v27_v5 = vld [vmem:[%s508_s2 + $0x28] sm:$0xff]  ;;  %v287_v6 = vld [vmem:[%s508_s2 + $0x30] sm:$0xff]  ;;  %v292_v7 = vld [vmem:[%s508_s2 + $0x38] sm:$0xff] }
   0x4   :  { %v301_v8 = vld [vmem:[%s509_s1 + $0x8] sm:$0xff]  ;;  %v306_v9 = vld [vmem:[%s509_s1] sm:$0xff]  ;;  %v315_v10 = vld [vmem:[%s509_s1 + $0x18] sm:$0xff] }
   0x5   :  { %v320_v11 = vld [vmem:[%s509_s1 + $0x10] sm:$0xff]  ;;  %v329_v12 = vld [vmem:[%s509_s1 + $0x28] sm:$0xff]  ;;  %v334_v13 = vld [vmem:[%s509_s1 + $0x20] sm:$0xff] }
   0x6   :  { %56 = vrot.lane.b32.xlu0 %v23_v2, %s238_s16  ;;  %60 = vrot.lane.b32.xlu1 %v25_v3, %s238_s16  ;;  %v339_v14 = vld [vmem:[%s510_s0] sm:$0xff]  ;;  %v348_v15 = vld [vmem:[%s510_s0 + $0x8] sm:$0xff] }
   0x7   :  { %v353_v16 = vld [vmem:[%s509_s1 + $0x38] sm:$0xff]  ;;  %v358_v17 = vld [vmem:[%s509_s1 + $0x30] sm:$0xff]  ;;  %v175_v18 = vmul.f32 %v339_v14, %v22_v0  ;;  %v176_v19 = vmul.f32 %v348_v15, %v23_v2  ;;  %v383_v24 = vld [vmem:[%s510_s0 + $0x20] sm:$0xff]  ;;  %v38_v61 = vmul.f32 %v339_v14, %v306_v9  ;;  %v39_v2 = vmul.f32 %v348_v15, %v301_v8 }
   0x8   :  { %v369_v20 = vld [vmem:[%s510_s0 + $0x10] sm:$0xff]  ;;  %v374_v21 = vld [vmem:[%s510_s0 + $0x18] sm:$0xff]  ;;  %v388_v25 = vld [vmem:[%s510_s0 + $0x28] sm:$0xff]  ;;  %v179_v26 = vmul.f32 %v383_v24, %v26_v4 }
   0x9   :  { %v177_v22 = vmul.f32 %v369_v20, %v24_v1  ;;  %v178_v23 = vmul.f32 %v374_v21, %v25_v3  ;;  %v180_v27 = vmul.f32 %v388_v25, %v27_v5  ;;  %v404_v39 = vld [vmem:[%s510_s0 + $0x30] sm:$0xff]  ;;  %v410_v41 = vld [vmem:[%s510_s0 + $0x38] sm:$0xff]  ;;  %v40_v3 = vmul.f32 %v369_v20, %v320_v11 }
   0xa   :  { %62 = vrot.lane.b32.xlu0 %v26_v4, %s238_s16  ;;  %64 = vrot.lane.b32.xlu1 %v27_v5, %s238_s16  ;;  %v181_v45 = vmul.f32 %v404_v39, %v287_v6  ;;  %v182_v47 = vmul.f32 %v410_v41, %v292_v7 }
   0xe   :  { %66 = vrot.lane.b32.xlu0 %v287_v6, %s238_s16  ;;  %68 = vrot.lane.b32.xlu1 %v292_v7, %s238_s16 }
  0x12   :  { %145 = vrot.lane.b32.xlu1 %v301_v8, %s238_s16  ;;  %143 = vrot.lane.b32.xlu0 %v306_v9, %s238_s16 }
  0x16   :  { %149 = vrot.lane.b32.xlu1 %v315_v10, %s238_s16  ;;  %147 = vrot.lane.b32.xlu0 %v320_v11, %s238_s16  ;;  %v41_v11 = vmul.f32 %v374_v21, %v315_v10 }
  0x1a   :  { %153 = vrot.lane.b32.xlu1 %v329_v12, %s238_s16  ;;  %151 = vrot.lane.b32.xlu0 %v334_v13, %s238_s16 }
  0x1e   :  { %157 = vrot.lane.b32.xlu1 %v353_v16, %s238_s16  ;;  %155 = vrot.lane.b32.xlu0 %v358_v17, %s238_s16 }
  0x22   :  { %193 = vrot.lane.b32.xlu1 %v176_v19, %s238_s16  ;;  %191 = vrot.lane.b32.xlu0 %v175_v18, %s238_s16 }
  0x26   :  { %197 = vrot.lane.b32.xlu1 %v178_v23, %s238_s16  ;;  %195 = vrot.lane.b32.xlu0 %v177_v22, %s238_s16 }
  0x2a   :  { %201 = vrot.lane.b32.xlu1 %v180_v27, %s238_s16  ;;  %199 = vrot.lane.b32.xlu0 %v179_v26, %s238_s16  ;;  %v44_v26 = vmul.f32 %v404_v39, %v358_v17 }
  0x74   :  { %v55_v28 = vpop.permute.xlu0 %54  ;;  %v59_v29 = vpop.permute.xlu1 %58 }
  0x75   :  { %v78_v30 = vmul.f32 %v55_v28, %v339_v14  ;;  %v80_v31 = vmul.f32 %v59_v29, %v369_v20 }
  0x77   :  { %94 = vrot.lane.b32.xlu0 %v78_v30, %s239_s29 }
  0x78   :  { %v57_v32 = vpop.permute.xlu0 %56  ;;  %v61_v33 = vpop.permute.xlu1 %60 }
  0x79   :  { %v79_v34 = vmul.f32 %v57_v32, %v348_v15  ;;  %v81_v35 = vmul.f32 %v61_v33, %v374_v21 }
  0x7b   :  { %96 = vrot.lane.b32.xlu1 %v79_v34, %s239_s29  ;;  %98 = vrot.lane.b32.xlu0 %v80_v31, %s239_s29  ;;  %v45_v31 = vmul.f32 %v410_v41, %v353_v16 }
  0x7c   :  { %v63_v36 = vpop.permute.xlu0 %62  ;;  %v65_v37 = vpop.permute.xlu1 %64 }
  0x7d   :  { %v82_v38 = vmul.f32 %v63_v36, %v383_v24  ;;  %v83_v40 = vmul.f32 %v65_v37, %v388_v25 }
  0x7f   :  { %100 = vrot.lane.b32.xlu1 %v81_v35, %s239_s29  ;;  %102 = vrot.lane.b32.xlu0 %v82_v38, %s239_s29 }
  0x80   :  { %v67_v42 = vpop.permute.xlu0 %66  ;;  %v69_v43 = vpop.permute.xlu1 %68 }
  0x81   :  { %v84_v44 = vmul.f32 %v67_v42, %v404_v39  ;;  %v85_v46 = vmul.f32 %v69_v43, %v410_v41 }
  0x83   :  { %104 = vrot.lane.b32.xlu1 %v83_v40, %s239_s29  ;;  %106 = vrot.lane.b32.xlu0 %v84_v44, %s239_s29 }
  0x84   :  { %v144_v48 = vpop.permute.xlu0 %143  ;;  %v146_v49 = vpop.permute.xlu1 %145 }
  0x85   :  { %v167_v62 = vmul.f32 %v144_v48, %v339_v14  ;;  %v168_v4 = vmul.f32 %v146_v49, %v348_v15  ;;  %v42_v15 = vmul.f32 %v383_v24, %v334_v13 }
  0x87   :  { %108 = vrot.lane.b32.xlu1 %v85_v46, %s239_s29  ;;  %203 = vrot.lane.b32.xlu0 %v181_v45, %s238_s16 }
  0x88   :  { %v148_v50 = vpop.permute.xlu0 %147  ;;  %v150_v51 = vpop.permute.xlu1 %149 }
  0x89   :  { %v169_v5 = vmul.f32 %v148_v50, %v369_v20  ;;  %v170_v18 = vmul.f32 %v150_v51, %v374_v21 }
  0x8b   :  { %205 = vrot.lane.b32.xlu1 %v182_v47, %s238_s16 }
  0x8c   :  { %v152_v52 = vpop.permute.xlu0 %151  ;;  %v154_v53 = vpop.permute.xlu1 %153 }
  0x8d   :  { %v171_v19 = vmul.f32 %v152_v52, %v383_v24  ;;  %v43_v24 = vmul.f32 %v388_v25, %v329_v12  ;;  %v172_v27 = vmul.f32 %v154_v53, %v388_v25 }
  0x90   :  { %v156_v54 = vpop.permute.xlu0 %155  ;;  %v158_v55 = vpop.permute.xlu1 %157 }
  0x91   :  { %v173_v33 = vmul.f32 %v156_v54, %v404_v39  ;;  %v174_v37 = vmul.f32 %v158_v55, %v410_v41 }
  0x94   :  { %v192_v56 = vpop.permute.xlu0 %191  ;;  %v194_v57 = vpop.permute.xlu1 %193 }
  0x95   :  { %v215_v6 = vadd.f32 %v192_v56, %v167_v62  ;;  %v216_v20 = vadd.f32 %v194_v57, %v168_v4 }
  0x98   :  { %v196_v58 = vpop.permute.xlu0 %195  ;;  %v198_v59 = vpop.permute.xlu1 %197 }
  0x99   :  { %v217_v22 = vadd.f32 %v196_v58, %v169_v5  ;;  %v218_v28 = vadd.f32 %v198_v59, %v170_v18 }
  0x9c   :  { %v200_v60 = vpop.permute.xlu0 %199  ;;  %v202_v63 = vpop.permute.xlu1 %201 }
  0x9d   :  { %v219_v29 = vadd.f32 %v200_v60, %v171_v19  ;;  %v220_v32 = vadd.f32 %v202_v63, %v172_v27 }
  0xe9   :  { %v95_v0 = vpop.permute.xlu0 %94 }
  0xea   :  { %v118_v1 = vsub.f32 %v38_v61, %v95_v0 }
  0xec   :  { %127 = vst.msk [vmem:[%s511_s3] sm:$0xff] %vm126_vm0, %v118_v1 }
  0xed   :  { %224 = vst.msk [vmem:[%s511_s3] sm:$0xff] %vm223_vm1, %v215_v6  ;;  %v97_v7 = vpop.permute.xlu1 %96  ;;  %v99_v8 = vpop.permute.xlu0 %98 }
  0xee   :  { %v119_v9 = vsub.f32 %v39_v2, %v97_v7  ;;  %v120_v14 = vsub.f32 %v40_v3, %v99_v8 }
  0xf0   :  { %128 = vst.msk [vmem:[%s511_s3 + $0x8] sm:$0xff] %vm126_vm0, %v119_v9  ;;  %129 = vst.msk [vmem:[%s511_s3 + $0x10] sm:$0xff] %vm126_vm0, %v120_v14 }
  0xf1   :  { %225 = vst.msk [vmem:[%s511_s3 + $0x8] sm:$0xff] %vm223_vm1, %v216_v20  ;;  %226 = vst.msk [vmem:[%s511_s3 + $0x10] sm:$0xff] %vm223_vm1, %v217_v22  ;;  %v101_v10 = vpop.permute.xlu1 %100  ;;  %v103_v13 = vpop.permute.xlu0 %102 }
  0xf2   :  { %v121_v21 = vsub.f32 %v41_v11, %v101_v10  ;;  %v122_v23 = vsub.f32 %v42_v15, %v103_v13 }
  0xf4   :  { %130 = vst.msk [vmem:[%s511_s3 + $0x18] sm:$0xff] %vm126_vm0, %v121_v21  ;;  %131 = vst.msk [vmem:[%s511_s3 + $0x20] sm:$0xff] %vm126_vm0, %v122_v23 }
  0xf5   :  { %227 = vst.msk [vmem:[%s511_s3 + $0x18] sm:$0xff] %vm223_vm1, %v218_v28  ;;  %228 = vst.msk [vmem:[%s511_s3 + $0x20] sm:$0xff] %vm223_vm1, %v219_v29  ;;  %v105_v12 = vpop.permute.xlu1 %104  ;;  %v107_v17 = vpop.permute.xlu0 %106 }
  0xf6   :  { %v123_v25 = vsub.f32 %v43_v24, %v105_v12  ;;  %v124_v30 = vsub.f32 %v44_v26, %v107_v17 }
  0xf8   :  { %132 = vst.msk [vmem:[%s511_s3 + $0x28] sm:$0xff] %vm126_vm0, %v123_v25  ;;  %133 = vst.msk [vmem:[%s511_s3 + $0x30] sm:$0xff] %vm126_vm0, %v124_v30 }
  0xf9   :  { %229 = vst.msk [vmem:[%s511_s3 + $0x28] sm:$0xff] %vm223_vm1, %v220_v32  ;;  %v109_v34 = vpop.permute.xlu1 %108  ;;  %v204_v16 = vpop.permute.xlu0 %203 }
  0xfa   :  { %v125_v35 = vsub.f32 %v45_v31, %v109_v34  ;;  %v221_v36 = vadd.f32 %v204_v16, %v173_v33 }
  0xfc   :  { %134 = vst.msk [vmem:[%s511_s3 + $0x38] sm:$0xff] %vm126_vm0, %v125_v35 }
  0xfd   :  { %230 = vst.msk [vmem:[%s511_s3 + $0x30] sm:$0xff] %vm223_vm1, %v221_v36  ;;  %v206_v38 = vpop.permute.xlu1 %205 }
  0xfe   :  { %v222_v39 = vadd.f32 %v206_v38, %v174_v37 }
 0x100   :  { %231 = vst.msk [vmem:[%s511_s3 + $0x38] sm:$0xff] %vm223_vm1, %v222_v39 }

</bundles_post_ra>
